<compile_context>
chip_gen: v6e
topology: v6e:2x2x1
jax: 0.10.0
libtpu: 0.0.40
codegen_flags: <defaults>
</compile_context>

<pallas_src>
import jax
import jax.numpy as jnp
from jax.experimental import pallas as pl
from jax.experimental.pallas import tpu as pltpu


# --------------------------------------------------------------------------- #
# Kernels
# --------------------------------------------------------------------------- #
def _make_direct_kernel(b_blk):
    """Single pass over the full L axis: out = M @ x per batch row."""

    def kernel(m_ref, x_ref, o_ref):
        m = m_ref[...]
        for i in range(b_blk):  # short static unroll over batch rows
            o_ref[i] = jnp.dot(
                m, x_ref[i], preferred_element_type=jnp.float32
            ).astype(o_ref.dtype)

    return kernel


def _make_acc_kernel(b_blk):
    """L axis tiled: accumulate partial M_blk @ x_blk products in f32 scratch."""

    def kernel(m_ref, x_ref, o_ref, acc_ref):
        @pl.when(pl.program_id(2) == 0)
        def _init():
            acc_ref[...] = jnp.zeros_like(acc_ref)

        m = m_ref[...]
        for i in range(b_blk):
            acc_ref[i] += jnp.dot(m, x_ref[i], preferred_element_type=jnp.float32)

        @pl.when(pl.program_id(2) == pl.num_programs(2) - 1)
        def _fin():
            o_ref[...] = acc_ref[...].astype(o_ref.dtype)

    return kernel


# --------------------------------------------------------------------------- #
# Static pooling matrix (replication padding + average pool fused)
# --------------------------------------------------------------------------- #
def _build_pool_matrix(L, kernel_size, stride):
    """(L_out, L) averaging matrix reproducing the PyTorch module semantics.

    front = (k-1)//2 copies of x[0]; end = (k-1)//2 (odd k) or k//2 (even k)
    copies of x[-1]; AvgPool1d(k, stride, padding=0) on the padded series.
    Equivalent to out[t] = (1/k) * sum_j x[clamp(t*stride + j - front, 0, L-1)].
    """
    front_n = (kernel_size - 1) // 2
    end_n = (kernel_size - 1) // 2 if kernel_size % 2 != 0 else kernel_size // 2
    L_pad = L + front_n + end_n
    L_out = (L_pad - kernel_size) // stride + 1

    t = jnp.arange(L_out)
    j = jnp.arange(kernel_size)
    idx = jnp.clip(t[:, None] * stride + j[None, :] - front_n, 0, L - 1)
    rows = jnp.broadcast_to(t[:, None], idx.shape)
    M = jnp.zeros((L_out, L), jnp.float32).at[rows, idx].add(1.0 / kernel_size)
    return M, L_out


# --------------------------------------------------------------------------- #
# Generation-aware sizing
# --------------------------------------------------------------------------- #
def _vmem_capacity_bytes():
    """Per-TensorCore VMEM capacity; conservative 64 MiB fallback (v7x)."""
    try:
        info = pltpu.get_tpu_info()
        for name in ("vmem_capacity_bytes", "vmem_size_bytes", "vmem_bytes"):
            cap = getattr(info, name, None)
            if cap:
                return int(cap)
    except Exception:
        pass
    return 64 * 1024 * 1024


def _choose_tiling(B, L, L_out, C, x_bytes, m_bytes, budget, max_l_block=None):
    """Pick (b_blk, l_blk, c_blk) keeping double-buffered tiles under budget."""
    out_bytes = x_bytes
    if C % 128 == 0:
        # Largest 128-multiple divisor of C (includes C itself, e.g. 384).
        c_cands = sorted(
            {c for c in (C, 2048, 1024, 512, 256, 128) if c <= C and C % c == 0},
            reverse=True)
    else:
        c_cands = [C]  # full-C block: legal, avoids any HBM pad copy
    # L blocks must be 128-multiples (M's lane axis) that divide L, or full L.
    l_cands = [L] + [l for l in (2048, 1024, 512, 256, 128) if l < L and L % l == 0]
    if max_l_block is not None:
        l_cands = [l for l in l_cands if l <= max_l_block] or [min(l_cands)]
    b_cands = [b for b in range(min(B, 8), 0, -1) if B % b == 0]

    for c_blk in c_cands:              # lane width first (biggest store-path lever)
        for l_blk in l_cands:          # then fewest reduction steps
            n_l = L // l_blk
            m_bufs = 1 if n_l == 1 else 2   # constant-index M -> single-buffered
            acc_bytes = 0 if n_l == 1 else 4 * L_out * c_blk
            for b_blk in b_cands:      # then fattest batch block
                need = (2 * b_blk * l_blk * c_blk * x_bytes        # x tile x2 buffers
                        + 2 * b_blk * L_out * c_blk * out_bytes    # out tile x2 buffers
                        + m_bufs * L_out * l_blk * m_bytes         # pooling matrix
                        + b_blk * acc_bytes)                       # f32 accumulator
                if need <= budget:
                    return b_blk, l_blk, c_blk
    return 1, min(l_cands), min(c_cands)


# --------------------------------------------------------------------------- #
# Public wrapper
# --------------------------------------------------------------------------- #
def moving_avg(x, kernel_size, stride, max_l_block=None):
    """Equivalent of the PyTorch `moving_avg.forward` for x of shape (B, L, C)."""
    B, L, C = x.shape
    M, L_out = _build_pool_matrix(L, kernel_size, stride)
    # bf16 x -> bf16 M: native MXU path (f32 accumulation via preferred_element_type).
    M = M.astype(x.dtype)

    vmem_cap = _vmem_capacity_bytes()
    vmem_limit = int(min(vmem_cap * 3 // 4, vmem_cap - (8 << 20)))
    tile_budget = int(max(vmem_cap // 2 - (2 << 20), 8 << 20))

    x_bytes = jnp.dtype(x.dtype).itemsize
    m_bytes = jnp.dtype(M.dtype).itemsize
    b_blk, l_blk, c_blk = _choose_tiling(
        B, L, L_out, C, x_bytes, m_bytes, tile_budget, max_l_block=max_l_block)
    n_b, n_c, n_l = B // b_blk, C // c_blk, L // l_blk

    cost = pl.CostEstimate(
        flops=2 * B * L_out * L * C,
        transcendentals=0,
        bytes_accessed=(B * L * C + B * L_out * C) * x_bytes + L_out * L * m_bytes,
    )

    if n_l == 1:
        # M's block index is constant across the whole grid; single-buffer it
        # when it is big enough for the extra buffer to matter (v7x VMEM).
        if L_out * L * m_bytes > (4 << 20):
            m_spec = pl.BlockSpec((L_out, L), lambda b, c: (0, 0),
                                  pipeline_mode=pl.Buffered(1))
        else:
            m_spec = pl.BlockSpec((L_out, L), lambda b, c: (0, 0))
        grid = (n_b, n_c)
        in_specs = [
            m_spec,
            pl.BlockSpec((b_blk, L, c_blk), lambda b, c: (b, 0, c)),
        ]
        out_specs = pl.BlockSpec((b_blk, L_out, c_blk), lambda b, c: (b, 0, c))
        scratch_shapes = ()
        dim_sem = ("parallel", "parallel")
        kernel = _make_direct_kernel(b_blk)
    else:
        # TODO(synk): M is banded (only k nonzeros per row); a windowed x fetch
        # would also cut the O(L_out*L) FLOPs, but needs element-granularity DMA.
        grid = (n_b, n_c, n_l)  # reduction axis last
        in_specs = [
            pl.BlockSpec((L_out, l_blk), lambda b, c, l: (0, l)),
            pl.BlockSpec((b_blk, l_blk, c_blk), lambda b, c, l: (b, l, c)),
        ]
        out_specs = pl.BlockSpec((b_blk, L_out, c_blk), lambda b, c, l: (b, 0, c))
        scratch_shapes = (pltpu.VMEM((b_blk, L_out, c_blk), jnp.float32),)
        dim_sem = ("parallel", "parallel", "arbitrary")
        kernel = _make_acc_kernel(b_blk)

    return pl.pallas_call(
        kernel,
        out_shape=jax.ShapeDtypeStruct((B, L_out, C), x.dtype),
        grid=grid,
        in_specs=in_specs,
        out_specs=out_specs,
        scratch_shapes=scratch_shapes,
        compiler_params=pltpu.CompilerParams(
            dimension_semantics=dim_sem,
            vmem_limit_bytes=vmem_limit,
        ),
        cost_estimate=cost,
    )(M, x)


# --------------------------------------------------------------------------- #
# Pure-JAX reference mirroring the PyTorch semantics
# --------------------------------------------------------------------------- #
def _reference_moving_avg(x, kernel_size, stride):
    B, L, C = x.shape
    front_n = (kernel_size - 1) // 2
    end_n = (kernel_size - 1) // 2 if kernel_size % 2 != 0 else kernel_size // 2
    front = jnp.repeat(x[:, 0:1, :], front_n, axis=1)
    end = jnp.repeat(x[:, L - 1:L, :], end_n, axis=1)
    xp = jnp.concatenate([front, x, end], axis=1)
    L_pad = L + front_n + end_n
    L_out = (L_pad - kernel_size) // stride + 1
    outs = [
        jnp.mean(xp[:, t * stride:t * stride + kernel_size, :], axis=1)
        for t in range(L_out)
    ]
    return jnp.stack(outs, axis=1)


if __name__ == "__main__":
    key = jax.random.PRNGKey(0)

    # 1) Narrow channels (C=8): unpadded full-C block path, odd kernel, stride 1.
    B, L, C = 2, 16, 8
    x = jax.random.normal(key, (B, L, C), dtype=jnp.float32)
    y = moving_avg(x, kernel_size=5, stride=1)
    jax.block_until_ready(y)
    ref = _reference_moving_avg(x, kernel_size=5, stride=1)
    assert y.shape == ref.shape
    assert jnp.allclose(y, ref, atol=1e-5, rtol=1e-5)

    # 2) Even kernel / stride > 1 branch.
    y = moving_avg(x, kernel_size=4, stride=2)
    jax.block_until_ready(y)
    ref = _reference_moving_avg(x, kernel_size=4, stride=2)
    assert y.shape == ref.shape
    assert jnp.allclose(y, ref, atol=1e-5, rtol=1e-5)

    # 3) Lane-aligned channels (C=128): tiled-channel path.
    x2 = jax.random.normal(jax.random.PRNGKey(0), (2, 16, 128), dtype=jnp.float32)
    y2 = moving_avg(x2, kernel_size=7, stride=1)
    jax.block_until_ready(y2)
    ref2 = _reference_moving_avg(x2, kernel_size=7, stride=1)
    assert y2.shape == ref2.shape
    assert jnp.allclose(y2, ref2, atol=1e-5, rtol=1e-5)

    # 4) L-tiled accumulator path (forced via max_l_block for a small test).
    x3 = jax.random.normal(jax.random.PRNGKey(0), (2, 256, 128), dtype=jnp.float32)
    y3 = moving_avg(x3, kernel_size=25, stride=1, max_l_block=128)
    jax.block_until_ready(y3)
    ref3 = _reference_moving_avg(x3, kernel_size=25, stride=1)
    assert y3.shape == ref3.shape
    assert jnp.allclose(y3, ref3, atol=1e-4, rtol=1e-4)

    # 5) bf16 inputs: native bf16 MXU path with f32 accumulation.
    x4 = jax.random.normal(jax.random.PRNGKey(0), (2, 32, 128), dtype=jnp.float32)
    x4_bf = x4.astype(jnp.bfloat16)
    y4 = moving_avg(x4_bf, kernel_size=5, stride=1)
    jax.block_until_ready(y4)
    ref4 = _reference_moving_avg(x4_bf.astype(jnp.float32), kernel_size=5, stride=1)
    assert y4.shape == ref4.shape
    assert jnp.allclose(y4.astype(jnp.float32), ref4, atol=2e-2, rtol=2e-2)

    print("KERNEL_OK")
</pallas_src>

<mosaic_0001>
module attributes {stable_mosaic.version = 11 : i64} {
  func.func @kernel(%arg0: i32, %arg1: i32, %arg2: memref<16x16xf32, #tpu.memory_space<vmem>>, %arg3: memref<2x16x8xf32, #tpu.memory_space<vmem>>, %arg4: memref<2x16x8xf32, #tpu.memory_space<vmem>>) attributes {dimension_semantics = [#tpu.dimension_semantics<parallel>, #tpu.dimension_semantics<parallel>], iteration_bounds = array<i64: 1, 1>, scalar_prefetch = 0 : i64, scratch_operands = 0 : i64, tpu.core_type = #tpu.core_type<tc>, window_params = [{pipeline_mode = #tpu.pipeline_mode<synchronous>, transform_indices = @transform_0, window_bounds = array<i64: 16, 16>}, {transform_indices = @transform_1, window_bounds = array<i64: 2, 16, 8>}, {transform_indices = @transform_2, window_bounds = array<i64: 2, 16, 8>}]} {
    %c0 = arith.constant 0 : index
    %c0_0 = arith.constant 0 : index
    %0 = vector.load %arg2[%c0, %c0_0] : memref<16x16xf32, #tpu.memory_space<vmem>>, vector<16x16xf32>
    %c0_1 = arith.constant 0 : index
    %c0_2 = arith.constant 0 : index
    %c0_3 = arith.constant 0 : index
    %1 = vector.load %arg3[%c0_1, %c0_2, %c0_3] : memref<2x16x8xf32, #tpu.memory_space<vmem>>, vector<1x16x8xf32>
    %2 = vector.shape_cast %1 : vector<1x16x8xf32> to vector<16x8xf32>
    %cst = arith.constant dense<0.000000e+00> : vector<16x8xf32>
    %3 = tpu.matmul %0, %2, %cst {dimension_numbers = #tpu.dot_dimension_numbers<[1], [0], [0], [1], [0, 0, 1, 1], [], []>} : vector<16x16xf32>, vector<16x8xf32>, vector<16x8xf32> -> vector<16x8xf32>
    %c0_4 = arith.constant 0 : index
    %c0_5 = arith.constant 0 : index
    %c0_6 = arith.constant 0 : index
    %4 = vector.load %arg4[%c0_4, %c0_5, %c0_6] : memref<2x16x8xf32, #tpu.memory_space<vmem>>, vector<1x16x8xf32>
    %5 = vector.shape_cast %4 : vector<1x16x8xf32> to vector<16x8xf32>
    %6 = vector.shape_cast %3 : vector<16x8xf32> to vector<1x16x8xf32>
    tpu.vector_store %arg4[%c0_4, %c0_5, %c0_6], %6 {strides = array<i32>} : memref<2x16x8xf32, #tpu.memory_space<vmem>>, vector<1x16x8xf32>,
    %c1 = arith.constant 1 : index
    %c0_7 = arith.constant 0 : index
    %c0_8 = arith.constant 0 : index
    %7 = vector.load %arg3[%c1, %c0_7, %c0_8] : memref<2x16x8xf32, #tpu.memory_space<vmem>>, vector<1x16x8xf32>
    %8 = vector.shape_cast %7 : vector<1x16x8xf32> to vector<16x8xf32>
    %cst_9 = arith.constant dense<0.000000e+00> : vector<16x8xf32>
    %9 = tpu.matmul %0, %8, %cst_9 {dimension_numbers = #tpu.dot_dimension_numbers<[1], [0], [0], [1], [0, 0, 1, 1], [], []>} : vector<16x16xf32>, vector<16x8xf32>, vector<16x8xf32> -> vector<16x8xf32>
    %c1_10 = arith.constant 1 : index
    %c0_11 = arith.constant 0 : index
    %c0_12 = arith.constant 0 : index
    %10 = vector.load %arg4[%c1_10, %c0_11, %c0_12] : memref<2x16x8xf32, #tpu.memory_space<vmem>>, vector<1x16x8xf32>
    %11 = vector.shape_cast %10 : vector<1x16x8xf32> to vector<16x8xf32>
    %12 = vector.shape_cast %9 : vector<16x8xf32> to vector<1x16x8xf32>
    tpu.vector_store %arg4[%c1_10, %c0_11, %c0_12], %12 {strides = array<i32>} : memref<2x16x8xf32, #tpu.memory_space<vmem>>, vector<1x16x8xf32>,
    return
  }
  func.func @transform_0(%arg0: i32, %arg1: i32) -> (i32, i32) {
    %c0_i32 = arith.constant 0 : i32
    %c0_i32_0 = arith.constant 0 : i32
    %c0_i32_1 = arith.constant 0 : i32
    return %c0_i32, %c0_i32_0 : i32, i32
  }
  func.func @transform_1(%arg0: i32, %arg1: i32) -> (i32, i32, i32) {
    %c0_i32 = arith.constant 0 : i32
    %c0_i32_0 = arith.constant 0 : i32
    return %arg0, %c0_i32, %arg1 : i32, i32, i32
  }
  func.func @transform_2(%arg0: i32, %arg1: i32) -> (i32, i32, i32) {
    %c0_i32 = arith.constant 0 : i32
    %c0_i32_0 = arith.constant 0 : i32
    return %arg0, %c0_i32, %arg1 : i32, i32, i32
  }
}

</mosaic_0001>

<bundles_post_ra>
// kernel: tpu_custom_call.1
= control target key start
LH: loop header
LB: loop body
LE: loop exit
PB: predicated region body
PF: predicated region fallthrough
CT: control target
= control target key end

     0   :  { %vm15_vm0 = vcmask 130048   ;;  %vm97_vm1 = vcmask 64512   ;;  %s260_s1 = inlined_call_operand.vmem [shape: f32[2,16,8], index: 1, kind: input, shape index: {}]   ;;  %s261_s0 = inlined_call_operand.vmem [shape: f32[16,16], index: 0, kind: input, shape index: {}]   ;;  %s262_s2 = inlined_call_operand.vmem [shape: f32[2,16,8], index: 2, kind: output, shape index: {}]  }
   0x1   :  { %v14_v0 = vld [vmem:[%s260_s1 + $0x8] sm:$0xff]  ;;  %v188_v1 = vld [vmem:[%s260_s1 + $0x18] sm:$0xff]  ;;  %v13_v2 = vld [vmem:[%s260_s1] sm:$0xff] }
   0x2   :  { %201 = vmatprep.subr.mxu0 %v14_v0  ;;  %208 = vmatprep.subr.mxu1 %v188_v1  ;;  %v187_v3 = vld [vmem:[%s260_s1 + $0x10] sm:$0xff]  ;;  %v11_v4 = vld [vmem:[%s261_s0] sm:$0xff]  ;;  %v12_v5 = vld [vmem:[%s261_s0 + $0x8] sm:$0xff] }
   0x3   :  { %202 = vmatpush3.msra.mxu0 %v14_v0  ;;  %209 = vmatpush3.msra.mxu1 %v188_v1 }
   0x4   :  { %203 = vmatprep.subr.mxu0 %v13_v2  ;;  %210 = vmatprep.subr.mxu1 %v187_v3 }
   0x5   :  { %204 = vmatpush3.msra.mxu0 %v13_v2  ;;  %205 = vmatprep.mubr.msk.f32.mxu0 %vm15_vm0, %v11_v4 }
   0x6   :  { %211 = vmatpush3.msra.mxu1 %v187_v3  ;;  %212 = vmatprep.mubr.msk.f32.mxu1 %vm15_vm0, %v11_v4 }
   0x7   :  { %206 = vmatmul.mubr.msk.f32.vlgmr.msra.gmra.mxu0 %vm15_vm0, %v12_v5  ;;  %213 = vmatmul.mubr.msk.f32.vlgmr.msra.gmra.mxu1 %vm15_vm0, %v12_v5 }
  0xc7   :  { %v207_v6 = vpop.f32.mrf.mxu0  ;;  %v214_v7 = vpop.f32.mrf.mxu1 }
  0xc8   :  { %99 = vst.msk [vmem:[%s262_s2 + $0x8] sm:$0xff] %vm97_vm1, %v207_v6  ;;  %192 = vst.msk [vmem:[%s262_s2 + $0x18] sm:$0xff] %vm97_vm1, %v214_v7 }
  0xc9   :  { %v88_v8 = vpop.f32.mrf.mxu0  ;;  %v169_v9 = vpop.f32.mrf.mxu1 }
  0xca   :  { %98 = vst.msk [vmem:[%s262_s2] sm:$0xff] %vm97_vm1, %v88_v8  ;;  %191 = vst.msk [vmem:[%s262_s2 + $0x10] sm:$0xff] %vm97_vm1, %v169_v9 }

</bundles_post_ra>
